<compile_context>
chip_gen: v5e
topology: v5e:2x2
jax: 0.10.0
libtpu: 0.0.40
codegen_flags: <defaults>
</compile_context>

<pallas_src>
import functools

import numpy as np
import jax
import jax.numpy as jnp
from jax.experimental import pallas as pl
from jax.experimental.pallas import tpu as pltpu

DIM = 11                     # InteNN(dim=11) -> odd, kept as-is
PAD = (DIM - 1) // 2         # "same" padding = 5


def _make_rbf_weight(dim: int) -> np.ndarray:
    """Exactly replicates the fixed Gaussian kernel from InteNN.__init_modules."""
    size_x, size_y = dim, dim
    A = np.ones(size_y)[:, None] * np.arange(size_x) / size_x
    B = np.arange(size_y)[::-1, None] * np.ones(size_x) / size_x
    mu1, mu2 = 0.5, 0.5
    sigma = 0.3
    custom = (np.exp(-((A - mu1) ** 2 + (B - mu2) ** 2) / 2 / sigma ** 2)
              / 2.5066 / sigma / size_x / size_y)
    return custom


@functools.lru_cache(maxsize=None)
def _make_toeplitz_factors(dim: int, H: int, W: int):
    """Separable factorization of the fixed RBF conv as two banded matmuls.

    custom[y, x] = fvec[y] * gvec[x] exactly, so
        conv2d(x, custom, padding=PAD) == Th @ x @ Tw
    with Th[i, h] = fvec[h - i + PAD], Tw[w, j] = gvec[w - j + PAD] (0 outside
    the band).  The zero "same" padding is folded into the bands.
    # TODO(synk): for H or W >= ~512, switch to a block-banded scheme (band
    # width 11 << 128) instead of dense (H,H)/(P*W,P*W) factors.
    """
    sigma = 0.3
    gx = np.exp(-((np.arange(dim) / dim - 0.5) ** 2) / (2.0 * sigma ** 2))
    fy = np.exp(-((np.arange(dim)[::-1] / dim - 0.5) ** 2) / (2.0 * sigma ** 2))
    s = np.sqrt(1.0 / (2.5066 * sigma * dim * dim))
    fvec, gvec = s * fy, s * gx

    ih = np.arange(H)
    d_h = ih[None, :] - ih[:, None] + PAD                 # h - i + PAD
    Th = np.where((d_h >= 0) & (d_h < dim), fvec[np.clip(d_h, 0, dim - 1)], 0.0)

    iw = np.arange(W)
    d_w = iw[:, None] - iw[None, :] + PAD                 # w - j + PAD
    Tw = np.where((d_w >= 0) & (d_w < dim), gvec[np.clip(d_w, 0, dim - 1)], 0.0)
    return Th.astype(np.float32), Tw.astype(np.float32)


def _vmem_capacity_bytes() -> int:
    try:
        return int(pltpu.get_tpu_info().vmem_capacity_bytes)
    except Exception:
        return 64 * 1024 * 1024   # v7x floor: be conservative if query fails


def _pick_tb(B: int, H: int, W: int, vmem_budget: int) -> int:
    """Batch elements per grid step: largest TB that (a) divides B, (b) keeps
    >= 2 grid steps when B >= 2 (both v7x TensorCores stay busy), (c) caps the
    block-diag Tw factor at 512 columns (bounds wasted MXU flops / VMEM), and
    (d) fits the per-step working set in the VMEM budget."""
    def est_bytes(tb):
        tbw = 3 * tb * W
        io_blocks = 2 * 2 * H * tbw * 4            # x + out blocks, double-buffered
        consts = (tbw * tbw + H * H + tbw) * 4     # TwBlk + Th + bias, single-buffered
        return io_blocks + consts

    best = 1
    for tb in range(1, B + 1):
        if B % tb:
            continue
        if B >= 2 and B // tb < 2:
            continue
        if 3 * tb * W > 512:
            continue
        if est_bytes(tb) > vmem_budget:
            continue
        best = tb
    return best


def _inte_kernel(th_ref, twb_ref, bias_ref, x_ref, o_ref):
    # th_ref  : (H, H)        column-pass Toeplitz factor (grid-invariant).
    # twb_ref : (P*W, P*W)    block-diag of the row-pass factor Tw, P = 3*TB.
    # bias_ref: (1, P*W)      per-column conv bias (bias[c] repeated over tb, w).
    # x_ref   : (H, P*W)      input slab for TB batch elems, cols = (tb, c, w).
    # o_ref   : (H, P*W)      output slab, cols = (tb, c, j).
    # Exactly two MXU matmuls per grid step; bias add is free VPU filler.
    z = jnp.dot(th_ref[...], x_ref[...], preferred_element_type=jnp.float32)
    o_ref[...] = (jnp.dot(z, twb_ref[...], preferred_element_type=jnp.float32)
                  + bias_ref[...])


def _forward_impl(x, bias):
    """x: (B, C, H, W) with C >= 3; returns (B, 3, H, W).

    Equivalent to: cat([conv2d(x[:, c:c+1], rbf_weight, bias[c], padding=5)
                        for c in range(3)], dim=1) with the fixed RBF weight.
    """
    B, C, H, W = x.shape
    assert C >= 3, "InteNN.forward uses channels 0..2"

    vmem_cap = _vmem_capacity_bytes()
    TB = _pick_tb(B, H, W, vmem_cap // 4)
    G = B // TB                     # grid length (>= 2 when B >= 2, for v7x)
    P = 3 * TB
    TBW = P * W                     # merged lane axis (lane-dense once >= 128)

    th_np, tw_np = _make_toeplitz_factors(DIM, H, W)
    th = jnp.asarray(th_np, jnp.float32)
    twblk = jnp.asarray(np.kron(np.eye(P, dtype=np.float32), tw_np), jnp.float32)
    bias_row = jnp.tile(jnp.repeat(bias.astype(jnp.float32), W), TB).reshape(1, TBW)

    # Layout plumbing (wrapper-side, fused by XLA under jit): pack TB batch
    # elements x 3 channels x W into one lane axis so the kernel sees 2D slabs.
    # NOTE: at the demo size (B=2, W=16) TBW=48 < 128 so stores stay masked;
    # with larger B (e.g. TB=8 at W=16 -> TBW=384) they become unmasked vst.
    xs = x[:, :3].astype(jnp.float32)                       # (B, 3, H, W)
    xt = xs.reshape(G, TB, 3, H, W)
    xt = jnp.transpose(xt, (0, 3, 1, 2, 4)).reshape(G, H, TBW)   # (G, H, TBW)

    const = pl.Buffered(1)          # grid-invariant inputs: no double-buffering
    out = pl.pallas_call(
        _inte_kernel,
        out_shape=jax.ShapeDtypeStruct((G, H, TBW), jnp.float32),
        grid=(G,),
        in_specs=[
            pl.BlockSpec((H, H), lambda g: (0, 0), pipeline_mode=const),
            pl.BlockSpec((TBW, TBW), lambda g: (0, 0), pipeline_mode=const),
            pl.BlockSpec((1, TBW), lambda g: (0, 0), pipeline_mode=const),
            pl.BlockSpec((None, H, TBW), lambda g: (g, 0, 0)),
        ],
        out_specs=pl.BlockSpec((None, H, TBW), lambda g: (g, 0, 0)),
        compiler_params=pltpu.CompilerParams(
            dimension_semantics=("parallel",),
            vmem_limit_bytes=int(min(vmem_cap // 2, 64 * 1024 * 1024))),
    )(th, twblk, bias_row, xt)

    # Unpack the slab back to NCHW (again fused by XLA under jit).
    out = out.reshape(G, H, TB, 3, W)
    out = jnp.transpose(out, (0, 2, 3, 1, 4)).reshape(B, 3, H, W)
    return out


inte_nn_forward = jax.jit(_forward_impl)


def _reference_forward(x, weight2d, bias):
    """Pure-JAX reference (lax conv with the full 2D kernel), high precision."""
    outs = []
    w = weight2d[None, None]  # OIHW
    for c in range(3):
        oc = jax.lax.conv_general_dilated(
            x[:, c:c + 1], w, window_strides=(1, 1),
            padding=[(PAD, PAD), (PAD, PAD)],
            precision=jax.lax.Precision.HIGHEST)
        outs.append(oc + bias[c])
    return jnp.concatenate(outs, axis=1)


if __name__ == "__main__":
    key = jax.random.PRNGKey(0)
    kx, kb = jax.random.split(key)

    # Small deterministic example input (forward needs >= 3 channels).
    B, C, H, W = 2, 4, 16, 16
    x = jax.random.normal(kx, (B, C, H, W), dtype=jnp.float32)

    # Conv2d biases are PyTorch's default random init in the module; here they
    # are initialized deterministically (uniform in +/- 1/sqrt(fan_in)).
    bound = 1.0 / np.sqrt(DIM * DIM)
    bias = jax.random.uniform(kb, (3,), minval=-bound, maxval=bound,
                              dtype=jnp.float32)

    out = inte_nn_forward(x, bias)
    out = jax.block_until_ready(out)

    weight2d = jnp.asarray(_make_rbf_weight(DIM), jnp.float32)
    ref = _reference_forward(x, weight2d, bias)
    assert out.shape == (B, 3, H, W)
    np.testing.assert_allclose(np.asarray(out), np.asarray(ref),
                               rtol=1e-4, atol=1e-5)

    print("KERNEL_OK")
</pallas_src>

<mosaic_0001>
module attributes {stable_mosaic.version = 11 : i64} {
  func.func @_inte_kernel(%arg0: i32, %arg1: memref<16x16xf32, #tpu.memory_space<vmem>>, %arg2: memref<48x48xf32, #tpu.memory_space<vmem>>, %arg3: memref<1x48xf32, #tpu.memory_space<vmem>>, %arg4: memref<1x16x48xf32, #tpu.memory_space<vmem>>, %arg5: memref<1x16x48xf32, #tpu.memory_space<vmem>>) attributes {dimension_semantics = [#tpu.dimension_semantics<parallel>], iteration_bounds = array<i64: 2>, scalar_prefetch = 0 : i64, scratch_operands = 0 : i64, tpu.core_type = #tpu.core_type<tc>, window_params = [{pipeline_mode = #tpu.pipeline_mode<synchronous>, transform_indices = @transform_0, window_bounds = array<i64: 16, 16>}, {pipeline_mode = #tpu.pipeline_mode<synchronous>, transform_indices = @transform_1, window_bounds = array<i64: 48, 48>}, {pipeline_mode = #tpu.pipeline_mode<synchronous>, transform_indices = @transform_2, window_bounds = array<i64: 1, 48>}, {transform_indices = @transform_3, window_bounds = array<i64: 1, 16, 48>}, {transform_indices = @transform_4, window_bounds = array<i64: 1, 16, 48>}]} {
    %c0 = arith.constant 0 : index
    %c0_0 = arith.constant 0 : index
    %0 = vector.load %arg1[%c0, %c0_0] : memref<16x16xf32, #tpu.memory_space<vmem>>, vector<16x16xf32>
    %c0_1 = arith.constant 0 : index
    %c0_2 = arith.constant 0 : index
    %c0_3 = arith.constant 0 : index
    %1 = vector.load %arg4[%c0_1, %c0_2, %c0_3] : memref<1x16x48xf32, #tpu.memory_space<vmem>>, vector<1x16x48xf32>
    %2 = vector.shape_cast %1 : vector<1x16x48xf32> to vector<16x48xf32>
    %cst = arith.constant dense<0.000000e+00> : vector<16x48xf32>
    %3 = tpu.matmul %0, %2, %cst {dimension_numbers = #tpu.dot_dimension_numbers<[1], [0], [0], [1], [0, 0, 1, 1], [], []>} : vector<16x16xf32>, vector<16x48xf32>, vector<16x48xf32> -> vector<16x48xf32>
    %c0_4 = arith.constant 0 : index
    %c0_5 = arith.constant 0 : index
    %4 = vector.load %arg2[%c0_4, %c0_5] : memref<48x48xf32, #tpu.memory_space<vmem>>, vector<48x48xf32>
    %cst_6 = arith.constant dense<0.000000e+00> : vector<16x48xf32>
    %5 = tpu.matmul %3, %4, %cst_6 {dimension_numbers = #tpu.dot_dimension_numbers<[1], [0], [0], [1], [0, 0, 1, 1], [], []>} : vector<16x48xf32>, vector<48x48xf32>, vector<16x48xf32> -> vector<16x48xf32>
    %c0_7 = arith.constant 0 : index
    %c0_8 = arith.constant 0 : index
    %6 = vector.load %arg3[%c0_7, %c0_8] : memref<1x48xf32, #tpu.memory_space<vmem>>, vector<1x48xf32>
    %7 = vector.broadcast %6 : vector<1x48xf32> to vector<16x48xf32>
    %8 = arith.addf %5, %7 : vector<16x48xf32>
    %c0_9 = arith.constant 0 : index
    %c0_10 = arith.constant 0 : index
    %c0_11 = arith.constant 0 : index
    %9 = vector.load %arg5[%c0_9, %c0_10, %c0_11] : memref<1x16x48xf32, #tpu.memory_space<vmem>>, vector<1x16x48xf32>
    %10 = vector.shape_cast %9 : vector<1x16x48xf32> to vector<16x48xf32>
    %11 = vector.shape_cast %8 : vector<16x48xf32> to vector<1x16x48xf32>
    tpu.vector_store %arg5[%c0_9, %c0_10, %c0_11], %11 {strides = array<i32>} : memref<1x16x48xf32, #tpu.memory_space<vmem>>, vector<1x16x48xf32>,
    return
  }
  func.func @transform_0(%arg0: i32) -> (i32, i32) {
    %c0_i32 = arith.constant 0 : i32
    %c0_i32_0 = arith.constant 0 : i32
    %c0_i32_1 = arith.constant 0 : i32
    return %c0_i32, %c0_i32_0 : i32, i32
  }
  func.func @transform_1(%arg0: i32) -> (i32, i32) {
    %c0_i32 = arith.constant 0 : i32
    %c0_i32_0 = arith.constant 0 : i32
    %c0_i32_1 = arith.constant 0 : i32
    return %c0_i32, %c0_i32_0 : i32, i32
  }
  func.func @transform_2(%arg0: i32) -> (i32, i32) {
    %c0_i32 = arith.constant 0 : i32
    %c0_i32_0 = arith.constant 0 : i32
    %c0_i32_1 = arith.constant 0 : i32
    return %c0_i32, %c0_i32_0 : i32, i32
  }
  func.func @transform_3(%arg0: i32) -> (i32, i32, i32) {
    %c0_i32 = arith.constant 0 : i32
    %c0_i32_0 = arith.constant 0 : i32
    %c0_i32_1 = arith.constant 0 : i32
    return %arg0, %c0_i32, %c0_i32_0 : i32, i32, i32
  }
  func.func @transform_4(%arg0: i32) -> (i32, i32, i32) {
    %c0_i32 = arith.constant 0 : i32
    %c0_i32_0 = arith.constant 0 : i32
    %c0_i32_1 = arith.constant 0 : i32
    return %arg0, %c0_i32, %c0_i32_0 : i32, i32, i32
  }
}

</mosaic_0001>

<bundles_post_ra>
// kernel: _forward_impl.1
= control target key start
LH: loop header
LB: loop body
LE: loop exit
PB: predicated region body
PF: predicated region fallthrough
CT: control target
= control target key end

     0   :  { %s396_s15 = smov 0   ;;  %s447_s0 = inlined_call_operand.vmem [shape: f32[16,16], index: 0, kind: input, shape index: {}]   ;;  %s448_s1 = inlined_call_operand.vmem [shape: f32[48,48], index: 1, kind: input, shape index: {}]   ;;  %s449_s2 = inlined_call_operand.vmem [shape: f32[1,48], index: 2, kind: input, shape index: {}]   ;;  %s450_s3 = inlined_call_operand.vmem [shape: f32[2,16,48], index: 3, kind: input, shape index: {}]   ;;  %s451_s4 = inlined_call_operand.vmem [shape: f32[2,16,48], index: 4, kind: output, shape index: {}]  }
   0x1 LB: > { %s329_s16 = sadd.s32 4294967295, %s369_s15   ;;  %p333_p0 = scmp.ge.s32.totalorder %s369_s15, 1  ;;  %s369_s15 = sphi %s396_s15, %s14_s15  }
   0x2   : > { %p162_p1 = scmp.lt.s32.totalorder %s369_s15, 3 }
   0x4   : > { %p163_p2 = pnand %p333_p0, %p162_p1 }
   0x5   : > { %p188_p3 = scmp.lt.s32.totalorder (!%p163_p2), %s329_s16, 1 }
   0x6   : > { %166 = sbr.rel (%p163_p2) target bundleno = 286 (0x11e), region = 36 }
   0xb   : > { %v237_v0 = vld [vmem:[%s448_s1 + $0x28] sm:$0xff]  ;;  %v236_v1 = vld [vmem:[%s448_s1 + $0x20] sm:$0xff]  ;;  %s453_s16 = smov (!%p188_p3, %s329_s16), 1  ;;  %v235_v2 = vld [vmem:[%s448_s1 + $0x18] sm:$0xff]  ;;  %vm202_vm0 = vcmask 130048   ;;  %vm242_vm1 = vcmask 392192  }
   0xc   : > { %348 = vmatpush.msra.mxu2 %v237_v0  ;;  %259 = vmatpush.msra.mxu1 %v237_v0  ;;  %s344_s23 = sshll.u32 %s453_s16, 4  ;;  %v234_v3 = vld [vmem:[%s448_s1 + $0x10] sm:$0xff]  ;;  %v199_v6 = vld [vmem:[%s447_s0 + $0x8] sm:$0xff]  ;;  %v198_v7 = vld [vmem:[%s447_s0] sm:$0xff] }
   0xd   : > { %s192_s26 = scalar_lea.vmem %s450_s3, %s344_s23  ;;  %v233_v8 = vld [vmem:[%s448_s1 + $0x8] sm:$0xff]  ;;  %v232_v9 = vld [vmem:[%s448_s1] sm:$0xff]  ;;  %s197_s17 = scalar_lea.vmem %s451_s4, %s344_s23 }
   0xe   : > { %349 = vmatpush.msra.mxu2 %v236_v1  ;;  %260 = vmatpush.msra.mxu1 %v236_v1  ;;  %v201_v4 = vld [vmem:[%s192_s26 + $0x8] sm:$0xff]  ;;  %v200_v5 = vld [vmem:[%s192_s26] sm:$0xff] }
   0xf   : > { %346 = vmatpush.msra.mxu3 %v201_v4  ;;  %223 = vmatpush.msra.mxu0 %v201_v4  ;;  %v362_v12 = vld [vmem:[%s449_s2] ss:$0 sm:$0xff] }
  0x10   : > { %350 = vmatpush.msra.mxu2 %v235_v2  ;;  %261 = vmatpush.msra.mxu1 %v235_v2 }
  0x11   : > { %347 = vmatpush.msra.mxu3 %v200_v5  ;;  %224 = vmatpush.msra.mxu0 %v200_v5 }
  0x12   : > { %351 = vmatpush.msra.mxu2 %v234_v3  ;;  %262 = vmatpush.msra.mxu1 %v234_v3 }
  0x13   : > { %339 = vmatmul.msk.f32.vlgmr.msra.gmra.mxu3 %vm202_vm0, %v199_v6  ;;  %338 = vmatmul.msk.f32.vlgmr.msra.gmra.mxu0 %vm202_vm0, %v198_v7 }
  0x14   : > { %352 = vmatpush.msra.mxu2 %v233_v8  ;;  %263 = vmatpush.msra.mxu1 %v233_v8 }
  0x16   : > { %353 = vmatpush.msra.mxu2 %v232_v9  ;;  %264 = vmatpush.msra.mxu1 %v232_v9 }
  0x90   : > { %v226_v10 = vpop.f32.mrf.mxu0 }
  0x91   : > { %340 = vmatmul.msk.f32.vlgmr.msra.gmra.mxu1 %vm242_vm1, %v226_v10 }
  0x96   : > { %v229_v11 = vpop.f32.mrf.mxu3 }
  0x97   : > { %341 = vmatmul.msk.f32.vlgmr.msra.gmra.mxu2 %vm242_vm1, %v229_v11 }
 0x10e   : > { %v266_v13 = vpop.f32.mrf.mxu1 }
 0x10f   : > { %v267_v14 = vadd.f32 %v362_v12, %v266_v13 }
 0x111   : > { %272 = vst.msk [vmem:[%s197_s17] sm:$0xff] %vm242_vm1, %v267_v14 }
 0x11a   : > { %v269_v15 = vpop.f32.mrf.mxu2 }
 0x11b   : > { %v270_v16 = vadd.f32 %v362_v12, %v269_v15 }
 0x11d   : > { %273 = vst.msk [vmem:[%s197_s17 + $0x8] sm:$0xff] %vm242_vm1, %v270_v16 }
 0x11e PF: > { %s14_s15 = sadd.s32 1, %s369_s15  }
 0x11f   : > { %p11_p4 = scmp.ge.s32.totalorder %s14_s15, 4  }
 0x121   :  { %13 = sbr.rel (!%p11_p4) target bundleno = 1 (0x1), region = 66 }

</bundles_post_ra>
